<compile_context>
chip_gen: v5e
topology: v5e:2x2
jax: 0.10.0
libtpu: 0.0.40
codegen_flags: <defaults>
</compile_context>

<pallas_src>
import functools

import numpy as np
import jax
import jax.numpy as jnp
from jax.experimental import pallas as pl
from jax.experimental.pallas import tpu as pltpu


def _dma_copy_kernel(x_hbm, o_hbm, sems, *, n_chunks, chunk_rows):
    """Identity copy: a few large HBM->HBM DMAs, all issued before any wait."""
    copies = []
    for i in range(n_chunks):
        if n_chunks == 1:
            src, dst = x_hbm, o_hbm
        else:
            r0 = i * chunk_rows          # static Python int -> tile-aligned slice
            src = x_hbm.at[pl.ds(r0, chunk_rows), :]
            dst = o_hbm.at[pl.ds(r0, chunk_rows), :]
        cp = pltpu.make_async_copy(src, dst, sems.at[i])
        cp.start()
        copies.append(cp)
    for cp in copies:                    # overlap: wait only after all are issued
        cp.wait()


def _lane_dense_2d(shape):
    """Factor the flat element count into (rows, cols) with cols a multiple of
    128 (lane-dense) and rows a multiple of 8 when possible (sublane-dense).
    Falls back to the original trailing dim for awkward element counts."""
    total = int(np.prod(shape)) if len(shape) else 1
    last = int(shape[-1]) if len(shape) else 1
    for c in (4096, 2048, 1024, 512, 256, 128):
        if total % c == 0 and (total // c) % 8 == 0:
            return total // c, c
    for c in (4096, 2048, 1024, 512, 256, 128):
        if total % c == 0:
            return total // c, c
    return max(total // max(last, 1), 1), max(last, 1)


def _pick_chunks(rows, max_chunks=4):
    """Split the copy into a few concurrent DMAs when rows divide into
    sublane-aligned (multiple-of-8) chunks; otherwise one whole-array DMA."""
    for n in range(max_chunks, 1, -1):
        if rows % n == 0 and (rows // n) % 8 == 0:
            return n, rows // n
    return 1, rows


def _pallas_identity_copy(x2d):
    """HBM->HBM DMA copy of a lane-dense 2D array (no VMEM staging)."""
    M, N = x2d.shape
    n_chunks, chunk_rows = _pick_chunks(M)
    kernel = functools.partial(
        _dma_copy_kernel, n_chunks=n_chunks, chunk_rows=chunk_rows
    )
    return pl.pallas_call(
        kernel,
        out_shape=jax.ShapeDtypeStruct((M, N), x2d.dtype),
        in_specs=[pl.BlockSpec(memory_space=pl.ANY)],   # raw HBM ref, no auto-DMA
        out_specs=pl.BlockSpec(memory_space=pl.ANY),    # raw HBM ref, no auto-DMA
        scratch_shapes=[pltpu.SemaphoreType.DMA((n_chunks,))],
    )(x2d)


class SplitDimPallas:
    """JAX/Pallas equivalent of the PyTorch SplitDim module."""

    def __init__(self, dim, new_shape):
        self.dim = dim
        self.new_shape = [int(d) for d in new_shape]
        assert sum(int(d == -1) for d in self.new_shape) <= 1, (
            "Only one dimension can be negative: %s" % self.new_shape
        )
        (self.idx,) = np.nonzero([d == -1 for d in self.new_shape])

    def __call__(self, x):
        dim = self.dim % x.ndim
        # Resolve the inferred (-1) dimension with exact integer division
        # (correctness fix vs the float-division original).
        new_sh = list(self.new_shape)
        if len(self.idx) > 0:
            new_sh[self.idx[0]] = 1
            known = int(np.prod(new_sh))
            assert int(x.shape[dim]) % known == 0, (
                "dim %d of size %d not divisible by %s" % (dim, x.shape[dim], new_sh)
            )
            new_sh[self.idx[0]] = int(x.shape[dim]) // known

        assert int(np.prod(new_sh)) == int(x.shape[dim]), (
            "split shape %s does not match dim size %d" % (new_sh, x.shape[dim])
        )
        out_shape = tuple(x.shape[:dim]) + tuple(new_sh) + tuple(x.shape[dim + 1:])

        # Glue: flatten to a lane-dense 2D slab (metadata-only in row-major
        # order), DMA-copy it through the kernel, reshape to the split shape.
        rows, cols = _lane_dense_2d(x.shape)
        x2d = jnp.reshape(x, (rows, cols))
        y2d = _pallas_identity_copy(x2d)
        return jnp.reshape(y2d, out_shape)


if __name__ == "__main__":
    key = jax.random.PRNGKey(0)
    k1, k2 = jax.random.split(key)

    # Test 1: NCHW-style input, split channel dim 1 (size 4) into (2, -1) -> (2, 2).
    x = jax.random.normal(k1, (2, 4, 16, 16), dtype=jnp.float32)
    module = SplitDimPallas(dim=1, new_shape=(2, -1))
    y = jax.block_until_ready(module(x))
    ref = jnp.reshape(x, (2, 2, 2, 16, 16))
    assert y.shape == (2, 2, 2, 16, 16), y.shape
    assert y.dtype == x.dtype
    np.testing.assert_allclose(np.asarray(y), np.asarray(ref), rtol=0, atol=0)

    # Test 2: negative dim, no -1: split last dim (size 32) into (4, 8).
    x2 = jax.random.normal(k2, (4, 8, 32), dtype=jnp.float32)
    module2 = SplitDimPallas(dim=-1, new_shape=(4, 8))
    y2 = jax.block_until_ready(module2(x2))
    ref2 = jnp.reshape(x2, (4, 8, 4, 8))
    assert y2.shape == (4, 8, 4, 8), y2.shape
    np.testing.assert_allclose(np.asarray(y2), np.asarray(ref2), rtol=0, atol=0)

    print("KERNEL_OK")
</pallas_src>

<mosaic_0001>
module attributes {stable_mosaic.version = 11 : i64} {
  func.func @_dma_copy_kernel(%arg0: memref<8x256xf32, #tpu.memory_space<any>>, %arg1: memref<8x256xf32, #tpu.memory_space<any>>, %arg2: memref<1x!tpu.dma_semaphore, #tpu.memory_space<semaphore_mem>>) attributes {dimension_semantics = [], scalar_prefetch = 0 : i64, scratch_operands = 1 : i64, tpu.core_type = #tpu.core_type<tc>} {
    %c0_i32 = arith.constant 0 : i32
    %0 = tpu.memref_slice %arg2[%c0_i32] : memref<1x!tpu.dma_semaphore, #tpu.memory_space<semaphore_mem>> -> memref<1x!tpu.dma_semaphore, #tpu.memory_space<semaphore_mem>>
    %1 = tpu.memref_squeeze %0 : memref<1x!tpu.dma_semaphore, #tpu.memory_space<semaphore_mem>> -> memref<!tpu.dma_semaphore, #tpu.memory_space<semaphore_mem>>
    tpu.enqueue_dma source(%arg0 : memref<8x256xf32, #tpu.memory_space<any>>) target(%arg1 : memref<8x256xf32, #tpu.memory_space<any>>) target_semaphore(%1 : memref<!tpu.dma_semaphore, #tpu.memory_space<semaphore_mem>>)
    %c0_i32_0 = arith.constant 0 : i32
    %2 = tpu.memref_slice %arg2[%c0_i32_0] : memref<1x!tpu.dma_semaphore, #tpu.memory_space<semaphore_mem>> -> memref<1x!tpu.dma_semaphore, #tpu.memory_space<semaphore_mem>>
    %3 = tpu.memref_squeeze %2 : memref<1x!tpu.dma_semaphore, #tpu.memory_space<semaphore_mem>> -> memref<!tpu.dma_semaphore, #tpu.memory_space<semaphore_mem>>
    tpu.wait_dma2 semaphore(%3 : memref<!tpu.dma_semaphore, #tpu.memory_space<semaphore_mem>>) src(%arg0 : memref<8x256xf32, #tpu.memory_space<any>>) dst(%arg1 : memref<8x256xf32, #tpu.memory_space<any>>)
    return
  }
}

</mosaic_0001>

<bundles_post_ra>
// kernel: tpu_custom_call.1
= control target key start
LH: loop header
LB: loop body
LE: loop exit
PB: predicated region body
PF: predicated region fallthrough
CT: control target
= control target key end

     0   :  { %s33_s12 = smov [#allocation2]   ;;  %s34_s13 = smov [#allocation3]   ;;  %s52_s0 = inlined_call_operand.hbm [shape: f32[8,256], index: 0, kind: input, shape index: {}]   ;;  %s53_s1 = inlined_call_operand.hbm [shape: f32[8,256], index: 1, kind: output, shape index: {}]  }
   0x1   :  { %s10_s8 = sshll.u32 %s52_s0, 4  ;;  %s12_s11 = sshll.u32 %s53_s1, 4  ;;  %s11_s8 = int_to_ptr.hbm [resolvable:$true] %s10_s8  ;;  %s13_s11 = int_to_ptr.hbm [resolvable:$true] %s12_s11 }
   0x2   :  { %s35_s14 = smov 0  }
   0x3   :  { %16 = dma.general %s11_s8, 256, %s13_s11, %s33_s12, %s34_s13, [#allocation4], %s35_s14, 0  }
   0x4   :  { %31 = dma.done.wait [#allocation2], 256 }
   0x5   :  { %32 = vsyncadd [#allocation2], 4294967040 }
   0x6   :  { %21 = vsyncmov [#allocation2] }
   0x9   :  { %s22_s15 = vpop.sfrf %21 }
   0xa   :  { %p27_p0 = scmp.ne.s32.totalorder %s22_s15, 0 }
   0xc   :  { %26 = shalt.err (%p27_p0)  }

</bundles_post_ra>
